<compile_context>
chip_gen: v5e
topology: v5e:2x2
jax: 0.10.0
libtpu: 0.0.40
codegen_flags: <defaults>
</compile_context>

<pallas_src>
import functools

import jax
import jax.numpy as jnp
from jax import lax
from jax.experimental import pallas as pl
from jax.experimental.pallas import tpu as pltpu


def _round_up(x, m):
    return (x + m - 1) // m * m


def _btconv_kernel(trees_ref, idx_ref, w_ref, b_ref, o_ref, *, tp, compute_dtype):
    """One grid step processes a block of NB batches.

    trees_ref: (NB, C_in_p, N_p)    compute_dtype
    idx_ref:   (NB, 1, 3*TP)        int32; lane k*TP + t holds the (already
               shifted-by-one) node index for tap k at output column t
    w_ref:     (C_out_p, 3*C_in_p)  compute_dtype; W_flat[o, k*C_in_p + c] = W[o, c, k]
    b_ref:     (C_out_p, 1)         float32
    o_ref:     (NB, C_out_p, TP)    column 0 is the prepended zero column,
                                    columns 1..T hold the conv result
    """
    nb = trees_ref.shape[0]
    n_p = trees_ref.shape[2]
    c_out_p = o_ref.shape[1]

    # Invariants hoisted out of the batch loop (built once per grid step).
    iota_n = lax.broadcasted_iota(jnp.int32, (n_p, 3 * tp), 0)   # node-id grid
    lane_t = lax.broadcasted_iota(jnp.int32, (c_out_p, tp), 1)   # output lane ids
    w_flat = w_ref[...]                                          # (C_out_p, 3*C_in_p)
    bias = b_ref[...].astype(jnp.float32)                        # (C_out_p, 1)

    def body(b, carry):
        tr = trees_ref[b]                                        # (C_in_p, N_p)
        idxw = idx_ref[b]                                        # (1, 3*TP) int32
        # Exact gather of all 3 taps as ONE one-hot matmul on the MXU (K = N_p).
        one_hot = (iota_n == idxw).astype(compute_dtype)         # (N_p, 3*TP)
        g_all = jnp.dot(tr, one_hot,
                        preferred_element_type=jnp.float32)      # (C_in_p, 3*TP)
        g_all = g_all.astype(compute_dtype)
        # im2col: stack the 3 taps along the contraction dim -> (3*C_in_p, TP).
        g = jnp.concatenate(
            [g_all[:, :tp], g_all[:, tp:2 * tp], g_all[:, 2 * tp:]], axis=0)
        # Single conv matmul, K = 3*C_in_p.
        conv = jnp.dot(w_flat, g,
                       preferred_element_type=jnp.float32) + bias  # (C_out_p, TP)
        # Column 0 is the prepended zero vector (idx was shifted in the wrapper).
        out = jnp.where(lane_t == 0, 0.0, conv)
        o_ref[b] = out.astype(o_ref.dtype)
        return carry

    lax.fori_loop(0, nb, body, 0)


def binary_tree_conv(trees, idxes, weight, bias, *,
                     compute_dtype=jnp.float32, batch_block=8):
    """Forward pass of BinaryTreeConv.

    trees:  (B, C_in, N) float32
    idxes:  (B, 3T, 1)   int
    weight: (C_out, C_in, 3) float32   (Conv1d weight)
    bias:   (C_out,)         float32   (Conv1d bias)
    compute_dtype: jnp.float32 (exact) or jnp.bfloat16 (bf16-native MXU path on
                   v5e/v6e/v7x, f32 accumulation).
    returns (results (B, C_out, T+1), idxes)
    """
    B, C_in, N = trees.shape
    threeT = idxes.shape[1]
    assert threeT % 3 == 0, "idxes second dim must be a multiple of 3"
    T = threeT // 3
    C_out, w_cin, ksz = weight.shape
    assert w_cin == C_in and ksz == 3, "weight must be (C_out, C_in, 3)"

    # TPU-friendly padded extents (zero padding is numerically exact here).
    C_in_p = _round_up(C_in, 8)
    C_out_p = _round_up(C_out, 8)
    N_p = _round_up(N, 128)
    TP = _round_up(T + 1, 128)              # output cols incl. the prepended zero col
    dsz = jnp.dtype(compute_dtype).itemsize

    # Per-grid-step working-set estimate: 2x double-buffered blocks + unblocked
    # params + in-kernel temporaries (one-hot, g_all, stacked g, conv).
    def step_bytes(nb):
        blocks = nb * (C_in_p * N_p * dsz + 3 * TP * 4 + C_out_p * TP * 4)
        fixed = C_out_p * 3 * C_in_p * dsz + C_out_p * 128 * 4
        tmps = (N_p * 3 * TP * dsz
                + C_in_p * 3 * TP * (4 + dsz)
                + 3 * C_in_p * TP * dsz
                + 2 * C_out_p * TP * 4)
        return 2 * blocks + fixed + tmps

    # NB: amortize ~0.35us per-grid-step overhead, but keep >= 2 grid steps when
    # B >= 2 (so the 'parallel' axis can shard across both TCs on v7x) and keep
    # the working set under ~44 MiB (safe on v7x's 64 MiB physical VMEM).
    NB = max(1, min(batch_block, (B + 1) // 2))
    budget = 44 * 1024 * 1024
    while NB > 1 and step_bytes(NB) > budget:
        NB //= 2
    B_p = _round_up(B, NB)
    vmem_limit = int(min(48 << 20, max(32 << 20, step_bytes(NB) + (2 << 20))))

    # ---- layout plumbing (cheap, done once per call, only int32/param tensors) ----
    trees_p = jnp.pad(trees, ((0, B_p - B), (0, C_in_p - C_in), (0, N_p - N)))
    trees_p = trees_p.astype(compute_dtype)

    # idx3[b, k, t] = idxes[b, 3t + k, 0]; shift right by one output column so the
    # kernel's column 0 becomes the prepended zero column, then flatten taps into
    # lanes: idx_wide[b, 0, k*TP + t].
    idx3 = idxes.reshape(B, T, 3).astype(jnp.int32).transpose(0, 2, 1)    # (B, 3, T)
    idx_sh = jnp.pad(idx3, ((0, B_p - B), (0, 0), (1, TP - T - 1)))       # (B_p, 3, TP)
    idx_wide = idx_sh.reshape(B_p, 1, 3 * TP)

    # W_flat[o, k*C_in_p + c] = weight[o, c, k]  (padded channels carry zeros).
    w_p = jnp.pad(weight, ((0, C_out_p - C_out), (0, C_in_p - C_in), (0, 0)))
    w_flat = jnp.transpose(w_p, (0, 2, 1)).reshape(C_out_p, 3 * C_in_p)
    w_flat = w_flat.astype(compute_dtype)

    b_p = jnp.pad(bias.astype(jnp.float32), (0, C_out_p - C_out)).reshape(C_out_p, 1)

    kernel = functools.partial(_btconv_kernel, tp=TP, compute_dtype=compute_dtype)

    out = pl.pallas_call(
        kernel,
        out_shape=jax.ShapeDtypeStruct((B_p, C_out_p, TP), trees.dtype),
        grid=(B_p // NB,),
        in_specs=[
            pl.BlockSpec((NB, C_in_p, N_p), lambda i: (i, 0, 0)),
            pl.BlockSpec((NB, 1, 3 * TP), lambda i: (i, 0, 0)),
            pl.BlockSpec((C_out_p, 3 * C_in_p), lambda i: (0, 0)),
            pl.BlockSpec((C_out_p, 1), lambda i: (0, 0)),
        ],
        out_specs=pl.BlockSpec((NB, C_out_p, TP), lambda i: (i, 0, 0)),
        compiler_params=pltpu.CompilerParams(
            dimension_semantics=("parallel",),
            vmem_limit_bytes=vmem_limit),
    )(trees_p, idx_wide, w_flat, b_p)

    # Strip padding; the zero column is already column 0 of the kernel output.
    results = out[:B, :C_out, :T + 1]
    return results, idxes


def _reference(trees, idxes, weight, bias):
    """Pure-JAX reference mirroring the PyTorch forward exactly."""
    B, C_in, N = trees.shape
    C_out = weight.shape[0]
    threeT = idxes.shape[1]
    idx = jnp.broadcast_to(idxes, (B, threeT, C_in)).transpose(0, 2, 1)
    expanded = jnp.take_along_axis(trees, idx, axis=2)
    conv = jax.lax.conv_general_dilated(
        expanded, weight, window_strides=(3,), padding="VALID",
        dimension_numbers=("NCH", "OIH", "NCH"))
    conv = conv + bias[None, :, None]
    zero_vec = jnp.zeros((B, C_out, 1), dtype=trees.dtype)
    return jnp.concatenate([zero_vec, conv], axis=2)


if __name__ == "__main__":
    key = jax.random.PRNGKey(0)
    k1, k2, k3, k4 = jax.random.split(key, 4)

    B, C_in, C_out = 2, 4, 8
    T = 8                    # number of tree nodes -> 3T gathered positions
    N = T + 1                # flattened tree length (index 0 is the pad slot)

    trees = jax.random.normal(k1, (B, C_in, N), dtype=jnp.float32)
    trees = trees.at[:, :, 0].set(0.0)                         # conventional zero pad node
    idxes = jax.random.randint(k2, (B, 3 * T, 1), 0, N, dtype=jnp.int32)

    # Deterministic Conv1d-style parameter init
    fan_in = C_in * 3
    bound = 1.0 / jnp.sqrt(jnp.float32(fan_in))
    weight = jax.random.uniform(k3, (C_out, C_in, 3), jnp.float32, -bound, bound)
    bias = jax.random.uniform(k4, (C_out,), jnp.float32, -bound, bound)

    # Exact f32 path.
    results, out_idxes = binary_tree_conv(trees, idxes, weight, bias)
    jax.block_until_ready(results)

    ref = _reference(trees, idxes, weight, bias)
    assert results.shape == (B, C_out, T + 1), results.shape
    assert out_idxes.shape == idxes.shape
    assert jnp.allclose(results, ref, atol=1e-5, rtol=1e-5), "f32 mismatch vs reference"

    # bf16 MXU fast path (recommended on v5e/v6e/v7x), f32 accumulation.
    results_bf16, _ = binary_tree_conv(trees, idxes, weight, bias,
                                       compute_dtype=jnp.bfloat16)
    jax.block_until_ready(results_bf16)
    assert jnp.allclose(results_bf16, ref, atol=5e-2, rtol=5e-2), "bf16 mismatch vs reference"

    print("KERNEL_OK")
</pallas_src>

<mosaic_0001>
module attributes {stable_mosaic.version = 11 : i64} {
  func.func @_btconv_kernel(%arg0: i32, %arg1: memref<1x8x128xf32, #tpu.memory_space<vmem>>, %arg2: memref<1x1x384xi32, #tpu.memory_space<vmem>>, %arg3: memref<8x24xf32, #tpu.memory_space<vmem>>, %arg4: memref<8x1xf32, #tpu.memory_space<vmem>>, %arg5: memref<1x8x128xf32, #tpu.memory_space<vmem>>) attributes {dimension_semantics = [#tpu.dimension_semantics<parallel>], iteration_bounds = array<i64: 2>, scalar_prefetch = 0 : i64, scratch_operands = 0 : i64, tpu.core_type = #tpu.core_type<tc>, window_params = [{transform_indices = @transform_0, window_bounds = array<i64: 1, 8, 128>}, {transform_indices = @transform_1, window_bounds = array<i64: 1, 1, 384>}, {pipeline_mode = #tpu.pipeline_mode<synchronous>, transform_indices = @transform_2, window_bounds = array<i64: 8, 24>}, {pipeline_mode = #tpu.pipeline_mode<synchronous>, transform_indices = @transform_3, window_bounds = array<i64: 8, 1>}, {transform_indices = @transform_4, window_bounds = array<i64: 1, 8, 128>}]} {
    %0 = tpu.iota {dimensions = array<i32: 0>} : vector<128x384xi32>
    %1 = tpu.iota {dimensions = array<i32: 1>} : vector<8x128xi32>
    %c0 = arith.constant 0 : index
    %c0_0 = arith.constant 0 : index
    %2 = vector.load %arg3[%c0, %c0_0] : memref<8x24xf32, #tpu.memory_space<vmem>>, vector<8x24xf32>
    %c0_1 = arith.constant 0 : index
    %c0_2 = arith.constant 0 : index
    %3 = vector.load %arg4[%c0_1, %c0_2] : memref<8x1xf32, #tpu.memory_space<vmem>>, vector<8x1xf32>
    %c0_i32 = arith.constant 0 : i32
    %4 = arith.index_cast %c0_i32 : i32 to index
    %c0_3 = arith.constant 0 : index
    %c0_4 = arith.constant 0 : index
    %5 = vector.load %arg1[%4, %c0_3, %c0_4] : memref<1x8x128xf32, #tpu.memory_space<vmem>>, vector<1x8x128xf32>
    %6 = vector.shape_cast %5 : vector<1x8x128xf32> to vector<8x128xf32>
    %7 = arith.index_cast %c0_i32 : i32 to index
    %c0_5 = arith.constant 0 : index
    %c0_6 = arith.constant 0 : index
    %8 = vector.load %arg2[%7, %c0_5, %c0_6] : memref<1x1x384xi32, #tpu.memory_space<vmem>>, vector<1x1x384xi32>
    %9 = vector.shape_cast %8 : vector<1x1x384xi32> to vector<1x384xi32>
    %10 = vector.broadcast %9 : vector<1x384xi32> to vector<128x384xi32>
    %11 = arith.cmpi eq, %0, %10 : vector<128x384xi32>
    %12 = arith.extui %11 : vector<128x384xi1> to vector<128x384xi32>
    %13 = arith.sitofp %12 : vector<128x384xi32> to vector<128x384xf32>
    %cst = arith.constant dense<0.000000e+00> : vector<8x384xf32>
    %14 = tpu.matmul %6, %13, %cst {dimension_numbers = #tpu.dot_dimension_numbers<[1], [0], [0], [1], [0, 0, 1, 1], [], []>} : vector<8x128xf32>, vector<128x384xf32>, vector<8x384xf32> -> vector<8x384xf32>
    %15 = vector.extract_strided_slice %14 {offsets = [0, 0], sizes = [8, 128], strides = [1, 1]} : vector<8x384xf32> to vector<8x128xf32>
    %16 = vector.extract_strided_slice %14 {offsets = [0, 128], sizes = [8, 128], strides = [1, 1]} : vector<8x384xf32> to vector<8x128xf32>
    %17 = vector.extract_strided_slice %14 {offsets = [0, 256], sizes = [8, 128], strides = [1, 1]} : vector<8x384xf32> to vector<8x128xf32>
    %18 = tpu.concatenate %15, %16, %17 in 0 : vector<8x128xf32>, vector<8x128xf32>, vector<8x128xf32> -> vector<24x128xf32>
    %cst_7 = arith.constant dense<0.000000e+00> : vector<8x128xf32>
    %19 = tpu.matmul %2, %18, %cst_7 {dimension_numbers = #tpu.dot_dimension_numbers<[1], [0], [0], [1], [0, 0, 1, 1], [], []>} : vector<8x24xf32>, vector<24x128xf32>, vector<8x128xf32> -> vector<8x128xf32>
    %20 = vector.broadcast %3 : vector<8x1xf32> to vector<8x128xf32>
    %21 = arith.addf %19, %20 : vector<8x128xf32>
    %c0_i32_8 = arith.constant 0 : i32
    %22 = vector.broadcast %c0_i32_8 : i32 to vector<8x128xi32>
    %23 = arith.cmpi eq, %1, %22 : vector<8x128xi32>
    %cst_9 = arith.constant 0.000000e+00 : f32
    %24 = vector.broadcast %cst_9 : f32 to vector<8x128xf32>
    %25 = arith.select %23, %24, %21 : vector<8x128xi1>, vector<8x128xf32>
    %26 = arith.index_cast %c0_i32 : i32 to index
    %c0_10 = arith.constant 0 : index
    %c0_11 = arith.constant 0 : index
    %27 = vector.load %arg5[%26, %c0_10, %c0_11] : memref<1x8x128xf32, #tpu.memory_space<vmem>>, vector<1x8x128xf32>
    %28 = vector.shape_cast %27 : vector<1x8x128xf32> to vector<8x128xf32>
    %29 = vector.shape_cast %25 : vector<8x128xf32> to vector<1x8x128xf32>
    tpu.vector_store %arg5[%26, %c0_10, %c0_11], %29 {strides = array<i32>} : memref<1x8x128xf32, #tpu.memory_space<vmem>>, vector<1x8x128xf32>,
    %c1_i32 = arith.constant 1 : i32
    return
  }
  func.func @transform_0(%arg0: i32) -> (i32, i32, i32) {
    %c0_i32 = arith.constant 0 : i32
    %c0_i32_0 = arith.constant 0 : i32
    %c0_i32_1 = arith.constant 0 : i32
    return %arg0, %c0_i32, %c0_i32_0 : i32, i32, i32
  }
  func.func @transform_1(%arg0: i32) -> (i32, i32, i32) {
    %c0_i32 = arith.constant 0 : i32
    %c0_i32_0 = arith.constant 0 : i32
    %c0_i32_1 = arith.constant 0 : i32
    return %arg0, %c0_i32, %c0_i32_0 : i32, i32, i32
  }
  func.func @transform_2(%arg0: i32) -> (i32, i32) {
    %c0_i32 = arith.constant 0 : i32
    %c0_i32_0 = arith.constant 0 : i32
    %c0_i32_1 = arith.constant 0 : i32
    return %c0_i32, %c0_i32_0 : i32, i32
  }
  func.func @transform_3(%arg0: i32) -> (i32, i32) {
    %c0_i32 = arith.constant 0 : i32
    %c0_i32_0 = arith.constant 0 : i32
    %c0_i32_1 = arith.constant 0 : i32
    return %c0_i32, %c0_i32_0 : i32, i32
  }
  func.func @transform_4(%arg0: i32) -> (i32, i32, i32) {
    %c0_i32 = arith.constant 0 : i32
    %c0_i32_0 = arith.constant 0 : i32
    %c0_i32_1 = arith.constant 0 : i32
    return %arg0, %c0_i32, %c0_i32_0 : i32, i32, i32
  }
}

</mosaic_0001>

<bundles_post_ra>
// kernel: tpu_custom_call.1
= control target key start
LH: loop header
LB: loop body
LE: loop exit
PB: predicated region body
PF: predicated region fallthrough
CT: control target
= control target key end

     0   :  { %s1250_s0 = inlined_call_operand.hbm [shape: f32[2,8,128], index: 0, kind: input, shape index: {}]   ;;  %s1251_s1 = inlined_call_operand.hbm [shape: s32[2,1,384], index: 1, kind: input, shape index: {}]   ;;  %s1252_s2 = inlined_call_operand.vmem [shape: f32[8,24], index: 2, kind: input, shape index: {}]   ;;  %s1253_s3 = inlined_call_operand.vmem [shape: f32[8,1], index: 3, kind: input, shape index: {}]   ;;  %s1254_s4 = inlined_call_operand.hbm [shape: f32[2,8,128], index: 4, kind: output, shape index: {}]  }
   0x1   :  { %1255 = sst [smem:[#allocation11_spill]] %s1250_s0 }
   0x2   :  { %9 = vsyncpa [#allocation3], 0 }
   0x3   :  { %11 = vsyncpa [#allocation3 + $0x1], 0 }
   0x4   :  { %12 = vsyncpa [#allocation6], 0 }
   0x5   :  { %14 = vsyncpa [#allocation6 + $0x1], 0 }
   0x6   :  { %15 = vsyncpa [#allocation4], 0 }
   0x7   :  { %17 = vsyncpa [#allocation4 + $0x1], 0  ;;  %s950_s15 = smov 0   ;;  %s952_s16 = smov 0  }
   0x8   :  { %s954_s17 = smov 0   ;;  %s956_s18 = smov 0  }
   0x9 LB: > { %s971_s19 = sadd.s32 4294967295, %s921_s18   ;;  %s625_s20 = sadd.s32 4294967294, %s921_s18   ;;  %s921_s18 = sphi %s956_s18, %s1267_s18   ;;  %s917_s17 = sphi %s954_s17, %s1266_s17   ;;  %s913_s16 = sphi %s952_s16, %s1265_s16   ;;  %s909_s15 = sphi %s950_s15, %s1264_s15  }
   0xa   : > { %s975_s21 = sadd.s32 1, %s921_s18   ;;  %s30_s22 = sadd.s32 1, %s917_s17 }
   0xb   : > { %s27_s23 = ssub.s32 %s921_s18, %s975_s21  ;;  %p37_p0 = scmp.ne.s32.totalorder %s917_s17, %s913_s16 }
   0xc   : > { %p28_p1 = scmp.eq.s32.totalorder %s27_s23, 0  ;;  %p38_p2 = scmp.eq.s32.totalorder %s921_s18, 0 }
   0xd   : > { %p43_p3 = scmp.ne.s32.totalorder %s913_s16, %s909_s15  ;;  %p44_p4 = scmp.eq.s32.totalorder %s971_s19, 0 }
   0xe   : > { %s987_s24 = scalar_select %p28_p1, %s917_s17, %s30_s22  }
   0xf   : > { %p989_p5 = por %p38_p2, %p37_p0  ;;  %p993_p6 = por %p44_p4, %p43_p3 }
  0x10   : > { %p135_p7 = scmp.eq.s32.totalorder %s971_s19, 1  ;;  %p141_p8 = scmp.eq.s32.totalorder %s625_s20, 1 }
  0x11   : > { %p754_p10 = scmp.lt.s32.totalorder %s921_s18, 2  ;;  %s1009_s29 = sand.u32 1, %s917_s17  }
  0x12   : > { %p1000_p11 = por %p135_p7, %p37_p0  ;;  %p1004_p12 = por %p141_p8, %p43_p3 }
  0x13   : > { %s629_s30 = sshll.u32 %s921_s18, 3  ;;  %s628_s5 = sshll.u32 %s1009_s29, 3 }
  0x14   : > { %s1260_s0 = sld [smem:[#allocation11_spill]]  ;;  %s171_s10 = scalar_lea.vmem [#allocation2], %s628_s5 }
  0x15   : > { %s179_s11 = sshll.u32 %s171_s10, 4  ;;  %p1018_p13 = pnand %p754_p10, %p989_p5  ;;  %s180_s11 = int_to_ptr.vmem [resolvable:$true] %s179_s11 }
  0x16   : > { %p630_p0 = scmp.ge.s32.totalorder %s921_s18, 1  ;;  %p203_p1 = scmp.lt.s32.totalorder %s921_s18, 3 }
  0x17   : > { %s734_s13 = smul.u32 3, %s1009_s29  ;;  %s168_s14 = scalar_lea.sflag [#allocation3], %s1009_s29 }
  0x18   : > { %p795_p3 = pneg %p1018_p13 }
  0x1a   : > { %s175_s8 = scalar_lea.hbm %s1260_s0, %s629_s30  ;;  %s798_s30 = scalar_lea.hbm %s1260_s0, 16 }
  0x1b   : > { %s177_s9 = sshll.u32 %s175_s8, 4  ;;  %s178_s9 = int_to_ptr.hbm [resolvable:$true] %s177_s9 }
  0x1c   : > { %s791_s20 = sshra.s32 %s178_s9, 4  ;;  %s792_s20 = int_to_ptr.hbm [resolvable:$true] %s791_s20 }
  0x1d   : > { %s793_s22 = scalar_lea.hbm %s792_s20, 8  ;;  %p799_p5 = scmp.lt.s32.totalorder %s792_s20, %s1260_s0 }
  0x1e   : > { %p794_p2 = scmp.ne.s32.totalorder %s792_s20, %s793_s22  ;;  %p800_p8 = scmp.lt.s32.totalorder %s798_s30, %s793_s22 }
  0x20   : > { %p796_p4 = pnand %p795_p3, %p794_p2  ;;  %p801_p10 = por %p800_p8, %p799_p5 }
  0x22   : > { %p797_p7 = pneg %p796_p4 }
  0x24   : > { %p802_p9 = pnand %p801_p10, %p797_p7 }
  0x26   : > { %805 = shalt.err (!%p802_p9)
}
  0x27   : > { %746 = dma.hbm_to_vmem [thread:$0]  (!%p1018_p13), %s178_s9, 128, %s180_s11, %s168_s14  }
  0x28   : > { %p1043_p2 = pnand %p630_p0, %p203_p1  ;;  %s735_s8 = smul.u32 3, %s921_s18 }
  0x29   : > { %s190_s10 = scalar_lea.vmem [#allocation5], %s734_s13  ;;  %s187_s5 = scalar_lea.sflag [#allocation6], %s1009_s29 }
  0x2a   : > { %s198_s20 = sshll.u32 %s190_s10, 4  ;;  %s194_s25 = scalar_lea.hbm %s1251_s1, %s735_s8  ;;  %s199_s20 = int_to_ptr.vmem [resolvable:$true] %s198_s20 }
  0x2b   : > { %s196_s30 = sshll.u32 %s194_s25, 4  ;;  %s828_s13 = scalar_lea.hbm %s1251_s1, 6  ;;  %s197_s30 = int_to_ptr.hbm [resolvable:$true] %s196_s30 }
  0x2c   : > { %s821_s6 = sshra.s32 %s197_s30, 4  ;;  %s822_s6 = int_to_ptr.hbm [resolvable:$true] %s821_s6 }
  0x2d   : > { %s823_s9 = scalar_lea.hbm %s822_s6, 3  ;;  %p829_p4 = scmp.lt.s32.totalorder %s822_s6, %s1251_s1 }
  0x2e   : > { %p824_p9 = scmp.ne.s32.totalorder %s822_s6, %s823_s9  ;;  %p830_p7 = scmp.lt.s32.totalorder %s828_s13, %s823_s9 }
  0x30   : > { %p826_p0 = pnand %p824_p9, %p795_p3  ;;  %p831_p5 = por %p830_p7, %p829_p4 }
  0x32   : > { %p827_p1 = pneg %p826_p0 }
  0x34   : > { %p832_p8 = pnand %p831_p5, %p827_p1 }
  0x36   : > { %835 = shalt.err (!%p832_p8)
}
  0x37   : > { %749 = dma.hbm_to_vmem [thread:$0]  (!%p1018_p13), %s197_s30, 48, %s199_s20, %s187_s5  }
  0x38   : > { %207 = sbr.rel (%p1043_p2) target bundleno = 379 (0x17b), region = 36  ;;  %s1066_s29 = sand.u32 (!%p1043_p2), 1, %s913_s16  }
  0x39   : > { %s631_s8 = sshll.u32 (!%p1043_p2), %s1066_s29, 3  ;;  %s210_s0 = scalar_lea.sflag (!%p1043_p2), [#allocation3], %s1066_s29 }
  0x3a   : > { %s1072_s22 = scalar_lea.vmem (!%p1043_p2), [#allocation2], %s631_s8 }
  0x3d   : > { %896 = dma.done.wait (%p993_p6), %s210_s0, 128  }
  0x3e   : > { %898 = vsyncadd (%p993_p6), %s210_s0, 4294967168  ;;  %s736_s12 = smul.u32 3, %s1066_s29  ;;  %s220_s7 = scalar_lea.sflag [#allocation6], %s1066_s29 }
  0x40   : > { %s223_s20 = scalar_lea.vmem [#allocation5], %s736_s12 }
  0x41   : > { %900 = dma.done.wait (%p993_p6), %s220_s7, 48  }
  0x42   : > { %902 = vsyncadd (%p993_p6), %s220_s7, 4294967248  ;;  %v254_v0 = vlaneseq  ;;  %v276_v4 = vld [vmem:[%s223_s20] sm:$0x7]  ;;  %v923_v10 = vmov 1.0   ;;  %v275_v22 = vld [vmem:[%s1072_s22] sm:$0xff]  ;;  %v924_v24 = vmov 0  }
  0x43   : > { %v1089_v5 = vperm.slane %v276_v4, 0  ;;  %v1091_v6 = vperm.slane %v276_v4, 1  ;;  %v1093_v7 = vperm.slane %v276_v4, 2  ;;  %v274_v23 = vld [vmem:[%s1253_s3] sm:$0xff]  ;;  %790 = vset.pattern.permute.xlu0 %v924_v24  ;;  %s731_s5 = sshll.u32 %s971_s19, 3  ;;  %s253_s14 = scalar_lea.vmem [#allocation7], %s631_s8 }
  0x44   : > { %v1085_v1 = vshrl.u32 %v254_v0, 7  ;;  %486 = vperm.xlu0 %790, %v274_v23   ;;  %v273_v28 = vld [vmem:[%s1252_s2] sm:$0xff]  ;;  %v272_v29 = vand.u32 127, %v254_v0  ;;  %s527_s11 = scalar_lea.hbm %s1254_s4, %s731_s5  ;;  %s529_s13 = sshll.u32 %s253_s14, 4  ;;  %s530_s13 = int_to_ptr.vmem [resolvable:$true] %s529_s13 }
  0x45   : > { %s531_s10 = sshll.u32 %s527_s11, 4  ;;  %s517_s19 = scalar_lea.sflag [#allocation4], %s1066_s29  ;;  %s532_s10 = int_to_ptr.hbm [resolvable:$true] %s531_s10 }
  0x46   : > { %v270_v2 = vadd.s32 120, %v1085_v1  ;;  %v269_v3 = vadd.s32 112, %v1085_v1  ;;  %v268_v8 = vadd.s32 104, %v1085_v1  ;;  %v267_v9 = vadd.s32 96, %v1085_v1  ;;  %s865_s0 = sshra.s32 %s532_s10, 4  ;;  %s871_s8 = scalar_lea.hbm %s1254_s4, 16  ;;  %s866_s0 = int_to_ptr.hbm [resolvable:$true] %s865_s0 }
  0x47   : > { %v266_v11 = vadd.s32 88, %v1085_v1  ;;  %v265_v12 = vadd.s32 80, %v1085_v1  ;;  %v264_v13 = vadd.s32 72, %v1085_v1  ;;  %v263_v14 = vadd.s32 64, %v1085_v1  ;;  %s867_s22 = scalar_lea.hbm %s866_s0, 8  ;;  %p872_p10 = scmp.lt.s32.totalorder %s866_s0, %s1254_s4 }
  0x48   : > { %vm327_vm0 = vcmp.eq.s32.totalorder %v270_v2, %v1093_v7  ;;  %vm324_vm1 = vcmp.eq.s32.totalorder %v269_v3, %v1093_v7  ;;  %vm326_vm2 = vcmp.eq.s32.totalorder %v270_v2, %v1091_v6  ;;  %vm325_vm3 = vcmp.eq.s32.totalorder %v270_v2, %v1089_v5  ;;  %p868_p6 = scmp.ne.s32.totalorder %s866_s0, %s867_s22  ;;  %p873_p2 = scmp.lt.s32.totalorder %s871_s8, %s867_s22 }
  0x49   : > { %713 = vmatpush.msk.msra.mxu2 %vm327_vm0, %v923_v10  ;;  %vm323_vm4 = vcmp.eq.s32.totalorder %v269_v3, %v1091_v6  ;;  %vm321_vm5 = vcmp.eq.s32.totalorder %v268_v8, %v1093_v7  ;;  %697 = vmatpush.msk.msra.mxu1 %vm326_vm2, %v923_v10  ;;  %vm322_vm6 = vcmp.eq.s32.totalorder %v269_v3, %v1089_v5  ;;  %v262_v15 = vadd.s32 56, %v1085_v1 }
  0x4a   : > { %681 = vmatpush.msk.msra.mxu0 %vm325_vm3, %v923_v10  ;;  %vm320_vm7 = vcmp.eq.s32.totalorder %v268_v8, %v1091_v6  ;;  %vm319_vm8 = vcmp.eq.s32.totalorder %v268_v8, %v1089_v5  ;;  %vm318_vm9 = vcmp.eq.s32.totalorder %v267_v9, %v1093_v7  ;;  %vm317_vm10 = vcmp.eq.s32.totalorder %v267_v9, %v1091_v6  ;;  %p869_p13 = pnand %p868_p6, %p1000_p11  ;;  %p874_p9 = por %p873_p2, %p872_p10 }
  0x4b   : > { %714 = vmatpush.msk.msra.mxu2 %vm324_vm1, %v923_v10  ;;  %698 = vmatpush.msk.msra.mxu1 %vm323_vm4, %v923_v10  ;;  %vm316_vm11 = vcmp.eq.s32.totalorder %v267_v9, %v1089_v5  ;;  %vm315_vm12 = vcmp.eq.s32.totalorder %v266_v11, %v1093_v7  ;;  %vm314_vm13 = vcmp.eq.s32.totalorder %v266_v11, %v1091_v6  ;;  %v261_v16 = vadd.s32 48, %v1085_v1 }
  0x4c   : > { %682 = vmatpush.msk.msra.mxu0 %vm322_vm6, %v923_v10  ;;  %vm313_vm14 = vcmp.eq.s32.totalorder %v266_v11, %v1089_v5  ;;  %vm312_vm15 = vcmp.eq.s32.totalorder %v265_v12, %v1093_v7  ;;  %vm311_vm0 = vcmp.eq.s32.totalorder %v265_v12, %v1091_v6  ;;  %vm310_vm1 = vcmp.eq.s32.totalorder %v265_v12, %v1089_v5  ;;  %p870_p3 = pneg %p869_p13 }
  0x4d   : > { %715 = vmatpush.msk.msra.mxu2 %vm321_vm5, %v923_v10  ;;  %699 = vmatpush.msk.msra.mxu1 %vm320_vm7, %v923_v10  ;;  %vm309_vm2 = vcmp.eq.s32.totalorder %v264_v13, %v1093_v7  ;;  %vm308_vm3 = vcmp.eq.s32.totalorder %v264_v13, %v1091_v6  ;;  %vm307_vm4 = vcmp.eq.s32.totalorder %v264_v13, %v1089_v5  ;;  %v260_v17 = vadd.s32 40, %v1085_v1 }
  0x4e   : > { %683 = vmatpush.msk.msra.mxu0 %vm319_vm8, %v923_v10  ;;  %vm306_vm5 = vcmp.eq.s32.totalorder %v263_v14, %v1093_v7  ;;  %vm305_vm6 = vcmp.eq.s32.totalorder %v263_v14, %v1091_v6  ;;  %vm304_vm7 = vcmp.eq.s32.totalorder %v263_v14, %v1089_v5  ;;  %vm303_vm8 = vcmp.eq.s32.totalorder %v262_v15, %v1093_v7  ;;  %p875_p0 = pnand %p874_p9, %p870_p3 }
  0x4f   : > { %716 = vmatpush.msk.msra.mxu2 %vm318_vm9, %v923_v10  ;;  %700 = vmatpush.msk.msra.mxu1 %vm317_vm10, %v923_v10  ;;  %vm302_vm9 = vcmp.eq.s32.totalorder %v262_v15, %v1091_v6  ;;  %vm301_vm10 = vcmp.eq.s32.totalorder %v262_v15, %v1089_v5  ;;  %v259_v18 = vadd.s32 32, %v1085_v1  ;;  %v258_v19 = vadd.s32 24, %v1085_v1 }
  0x50   : > { %684 = vmatpush.msk.msra.mxu0 %vm316_vm11, %v923_v10  ;;  %vm300_vm11 = vcmp.eq.s32.totalorder %v261_v16, %v1093_v7  ;;  %v257_v20 = vadd.s32 16, %v1085_v1  ;;  %v256_v21 = vadd.s32 8, %v1085_v1 }
  0x51   : > { %717 = vmatpush.msk.msra.mxu2 %vm315_vm12, %v923_v10  ;;  %701 = vmatpush.msk.msra.mxu1 %vm314_vm13, %v923_v10  ;;  %vm299_vm12 = vcmp.eq.s32.totalorder %v261_v16, %v1091_v6  ;;  %vm298_vm13 = vcmp.eq.s32.totalorder %v261_v16, %v1089_v5 }
  0x52   : > { %685 = vmatpush.msk.msra.mxu0 %vm313_vm14, %v923_v10  ;;  %vm297_vm14 = vcmp.eq.s32.totalorder %v260_v17, %v1093_v7 }
  0x53   : > { %718 = vmatpush.msk.msra.mxu2 %vm312_vm15, %v923_v10  ;;  %702 = vmatpush.msk.msra.mxu1 %vm311_vm0, %v923_v10  ;;  %vm296_vm15 = vcmp.eq.s32.totalorder %v260_v17, %v1091_v6  ;;  %vm295_vm0 = vcmp.eq.s32.totalorder %v260_v17, %v1089_v5 }
  0x54   : > { %686 = vmatpush.msk.msra.mxu0 %vm310_vm1, %v923_v10  ;;  %vm294_vm1 = vcmp.eq.s32.totalorder %v259_v18, %v1093_v7 }
  0x55   : > { %719 = vmatpush.msk.msra.mxu2 %vm309_vm2, %v923_v10  ;;  %703 = vmatpush.msk.msra.mxu1 %vm308_vm3, %v923_v10  ;;  %vm293_vm2 = vcmp.eq.s32.totalorder %v259_v18, %v1091_v6  ;;  %vm292_vm3 = vcmp.eq.s32.totalorder %v259_v18, %v1089_v5 }
  0x56   : > { %687 = vmatpush.msk.msra.mxu0 %vm307_vm4, %v923_v10  ;;  %vm291_vm4 = vcmp.eq.s32.totalorder %v258_v19, %v1093_v7 }
  0x57   : > { %720 = vmatpush.msk.msra.mxu2 %vm306_vm5, %v923_v10  ;;  %704 = vmatpush.msk.msra.mxu1 %vm305_vm6, %v923_v10  ;;  %vm290_vm5 = vcmp.eq.s32.totalorder %v258_v19, %v1091_v6  ;;  %vm289_vm6 = vcmp.eq.s32.totalorder %v258_v19, %v1089_v5 }
  0x58   : > { %688 = vmatpush.msk.msra.mxu0 %vm304_vm7, %v923_v10  ;;  %vm288_vm7 = vcmp.eq.s32.totalorder %v257_v20, %v1093_v7 }
  0x59   : > { %721 = vmatpush.msk.msra.mxu2 %vm303_vm8, %v923_v10  ;;  %705 = vmatpush.msk.msra.mxu1 %vm302_vm9, %v923_v10  ;;  %vm287_vm8 = vcmp.eq.s32.totalorder %v257_v20, %v1091_v6  ;;  %vm286_vm9 = vcmp.eq.s32.totalorder %v257_v20, %v1089_v5 }
  0x5a   : > { %689 = vmatpush.msk.msra.mxu0 %vm301_vm10, %v923_v10  ;;  %vm285_vm10 = vcmp.eq.s32.totalorder %v256_v21, %v1093_v7 }
  0x5b   : > { %722 = vmatpush.msk.msra.mxu2 %vm300_vm11, %v923_v10  ;;  %706 = vmatpush.msk.msra.mxu1 %vm299_vm12, %v923_v10  ;;  %vm284_vm11 = vcmp.eq.s32.totalorder %v256_v21, %v1091_v6  ;;  %vm283_vm12 = vcmp.eq.s32.totalorder %v256_v21, %v1089_v5 }
  0x5c   : > { %690 = vmatpush.msk.msra.mxu0 %vm298_vm13, %v923_v10  ;;  %vm282_vm13 = vcmp.eq.s32.totalorder %v1085_v1, %v1093_v7 }
  0x5d   : > { %723 = vmatpush.msk.msra.mxu2 %vm297_vm14, %v923_v10  ;;  %707 = vmatpush.msk.msra.mxu1 %vm296_vm15, %v923_v10  ;;  %vm281_vm14 = vcmp.eq.s32.totalorder %v1085_v1, %v1091_v6  ;;  %vm280_vm15 = vcmp.eq.s32.totalorder %v1085_v1, %v1089_v5 }
  0x5e   : > { %691 = vmatpush.msk.msra.mxu0 %vm295_vm0, %v923_v10  ;;  %vm489_vm0 = vcmask 195584  }
  0x5f   : > { %724 = vmatpush.msk.msra.mxu2 %vm294_vm1, %v923_v10  ;;  %708 = vmatpush.msk.msra.mxu1 %vm293_vm2, %v923_v10  ;;  %vm513_vm1 = vcmp.eq.s32.totalorder %v272_v29, 0 }
  0x60   : > { %692 = vmatpush.msk.msra.mxu0 %vm292_vm3, %v923_v10 }
  0x61   : > { %725 = vmatpush.msk.msra.mxu2 %vm291_vm4, %v923_v10  ;;  %709 = vmatpush.msk.msra.mxu1 %vm290_vm5, %v923_v10 }
  0x62   : > { %693 = vmatpush.msk.msra.mxu0 %vm289_vm6, %v923_v10 }
  0x63   : > { %726 = vmatpush.msk.msra.mxu2 %vm288_vm7, %v923_v10  ;;  %710 = vmatpush.msk.msra.mxu1 %vm287_vm8, %v923_v10 }
  0x64   : > { %694 = vmatpush.msk.msra.mxu0 %vm286_vm9, %v923_v10 }
  0x65   : > { %727 = vmatpush.msk.msra.mxu2 %vm285_vm10, %v923_v10  ;;  %711 = vmatpush.msk.msra.mxu1 %vm284_vm11, %v923_v10 }
  0x66   : > { %695 = vmatpush.msk.msra.mxu0 %vm283_vm12, %v923_v10 }
  0x67   : > { %728 = vmatpush.msk.msra.mxu2 %vm282_vm13, %v923_v10  ;;  %712 = vmatpush.msk.msra.mxu1 %vm281_vm14, %v923_v10 }
  0x68   : > { %480 = vmatmul.f32.vlgmr.msra.gmra.mxu2 %v275_v22  ;;  %460 = vmatmul.f32.vlgmr.msra.gmra.mxu1 %v275_v22 }
  0x69   : > { %696 = vmatpush.msk.msra.mxu0 %vm280_vm15, %v923_v10 }
  0x6a   : > { %440 = vmatmul.f32.vlgmr.msra.gmra.mxu0 %v275_v22 }
  0xb6   : > { %v487_v30 = vpop.permute.xlu0 %486 }
  0xe5   : > { %v461_v26 = vpop.f32.mrf.mxu1 }
  0xe7   : > { %v441_v27 = vpop.f32.mrf.mxu0 }
  0xeb   : > { %v481_v25 = vpop.f32.mrf.mxu2 }
  0xec   : > { %506 = vmatpush.msra.mxu3 %v481_v25 }
  0xee   : > { %507 = vmatpush.msra.mxu3 %v461_v26 }
  0xf0   : > { %508 = vmatpush.msra.mxu3 %v441_v27 }
  0xf1   : > { %729 = vmatmul.msk.f32.vlgmr.msra.gmra.mxu3 %vm489_vm0, %v273_v28 }
 0x174   : > { %v510_v31 = vpop.f32.mrf.mxu3 }
 0x175   : > { %v511_v32 = vadd.f32 %v510_v31, %v487_v30 }
 0x177   : > { %v514_v33 = vsel %vm513_vm1, 0.0, %v511_v32 }
 0x178   : > { %515 = vst [vmem:[%s253_s14] sm:$0xff] %v514_v33 }
 0x179   : > { %878 = shalt.err (!%p875_p0)
}
 0x17a   : > { %741 = dma.vmem_to_hbm [thread:$0]  (%p1000_p11), %s530_s13, 128, %s532_s10, %s517_s19  }
 0x17b PF: > { %s543_s29 = sand.u32 1, %s909_s15   ;;  %p1263_p1 = scmp.ge.s32.totalorder %s921_s18, 2 }
 0x17c   : > { %s544_s23 = scalar_lea.sflag [#allocation4], %s543_s29 }
 0x17d   : > { %p751_p4 = pnand %p1263_p1, %p1004_p12 }
 0x17f   : > { %p752_p7 = pneg %p751_p4 }
 0x181   : > { %904 = dma.done.wait (%p752_p7), %s544_s23, 128  }
 0x182   : > { %906 = vsyncadd (%p752_p7), %s544_s23, 4294967168  ;;  %p20_p5 = scmp.ge.s32.totalorder %s975_s21, 4   ;;  %s1264_s15 = smov %s913_s16 }
 0x183   : > { %s1265_s16 = smov %s917_s17  ;;  %s1266_s17 = smov %s987_s24 }
 0x184   : > { %s1267_s18 = smov %s975_s21  ;;  %22 = sbr.rel (!%p20_p5) target bundleno = 9 (0x9), region = 94 }
 0x189   :  { %550 = vsyncpa [#allocation3], 1 }
 0x18a   :  { %552 = vsyncpa [#allocation3 + $0x1], 1 }
 0x18b   :  { %553 = vsyncpa [#allocation6], 1 }
 0x18c   :  { %555 = vsyncpa [#allocation6 + $0x1], 1 }
 0x18d   :  { %556 = vsyncpa [#allocation4], 1 }
 0x18e   :  { %558 = vsyncpa [#allocation4 + $0x1], 1 }

</bundles_post_ra>
